<compile_context>
chip_gen: v7x
topology: tpu7x:2x2x1
jax: 0.10.0
libtpu: 0.0.40
codegen_flags: <defaults>
</compile_context>

<pallas_src>
import jax
import jax.numpy as jnp
from jax.experimental import pallas as pl
from jax.experimental.pallas import tpu as pltpu


def _cdiv(a, b):
    return (a + b - 1) // b


def _round_up(a, b):
    return _cdiv(a, b) * b


def _one_hot_kernel(t_ref, o_ref):
    # t_ref: (1, 1, *spatial_tile) int32 labels
    # o_ref: (1, tc, *spatial_tile) one-hot tile (class axis = dim 1)
    tc = o_ref.shape[1]
    c0 = pl.program_id(1) * tc                       # class offset of this tile
    classes = c0 + jax.lax.broadcasted_iota(jnp.int32, o_ref.shape, 1)
    # labels broadcast over the class axis; cheap VPU compare + cast.
    o_ref[...] = (t_ref[...] == classes).astype(o_ref.dtype)


def one_hot_encoder(t, n_classes, *, out_dtype=jnp.float32,
                    target_tile_bytes=8 << 20):
    """Pallas equivalent of OneHotEncoder.forward.

    t: integer array of shape (N, *spatial)
    returns: `out_dtype` array of shape (N, n_classes, *spatial), NCHW layout.
    (out_dtype defaults to float32 to match PyTorch's .float(); pass bf16/int8
    to cut output HBM traffic if the consumer allows.)
    """
    n_classes = int(n_classes)
    n = int(t.shape[0])
    spatial = tuple(int(d) for d in t.shape[1:])
    hw = 1
    for d in spatial:
        hw *= d

    out_dtype = jnp.dtype(out_dtype)
    elem_bytes = out_dtype.itemsize
    # min sublane multiple for the output dtype: f32 -> 8, bf16 -> 16, i8 -> 32
    sub = max(8, 8 * (4 // elem_bytes))

    # ---- class tiling: full dim when small, else balanced tiles -------------
    tc_cap = 512
    if n_classes <= tc_cap:
        tc = n_classes                                   # full dim (exempt)
    else:
        tc = _round_up(_cdiv(n_classes, _cdiv(n_classes, tc_cap)), sub)
    c_tiles = _cdiv(n_classes, tc)

    labels = t.reshape(n, hw).astype(jnp.int32)          # no padding copies

    # ---- layout choice -------------------------------------------------------
    # The TPU HBM layout pads the minor-2 dim to `sub`; with the class axis in
    # that position a small C (e.g. 4) inflates write traffic ~2x.  When HW is
    # 128-divisible and it pays off, emit (N, C, HW//128, 128) instead: same
    # row-major memory order (reshape back is free) but C leaves minor-2.
    use_4d = False
    s = 0
    if hw > 0 and hw % 128 == 0:
        s = hw // 128
        use_4d = n_classes * _round_up(s, sub) < _round_up(n_classes, sub) * s

    if use_4d:
        # spatial tile = t_s rows of 128 lanes, multiple of `sub` (or full S)
        rows_budget = target_tile_bytes // (elem_bytes * tc * 128)
        t_s = max(sub, (rows_budget // sub) * sub)
        if t_s >= s:
            t_s = s
        # keep enough grid steps for megacore sharding + double buffering
        while n * c_tiles * _cdiv(s, t_s) < 8 and t_s > sub:
            t_s = max(sub, _round_up(t_s // 2, sub))
        s_tiles = _cdiv(s, t_s)

        spatial_tile_elems = t_s * 128
        grid = (n, c_tiles, s_tiles)
        in_specs = [pl.BlockSpec((1, 1, t_s, 128), lambda b, c, j: (b, 0, j, 0))]
        out_specs = pl.BlockSpec((1, tc, t_s, 128), lambda b, c, j: (b, c, j, 0))
        out_shape = jax.ShapeDtypeStruct((n, n_classes, s, 128), out_dtype)
        kernel_in = labels.reshape(n, 1, s, 128)
    else:
        # lane-dense spatial tile, multiple of 128 (or the full HW)
        t_hw = (target_tile_bytes // (elem_bytes * max(tc, 1))) // 128 * 128
        t_hw = max(128, min(t_hw, 65536))
        if t_hw >= hw:
            t_hw = hw                                     # full dim (exempt)
        while n * c_tiles * _cdiv(hw, t_hw) < 8 and t_hw > 128:
            t_hw = max(128, _round_up(t_hw // 2, 128))
        hw_tiles = _cdiv(hw, t_hw)

        spatial_tile_elems = t_hw
        grid = (n, c_tiles, hw_tiles)
        in_specs = [pl.BlockSpec((1, 1, t_hw), lambda b, c, j: (b, 0, j))]
        out_specs = pl.BlockSpec((1, tc, t_hw), lambda b, c, j: (b, c, j))
        out_shape = jax.ShapeDtypeStruct((n, n_classes, hw), out_dtype)
        kernel_in = labels.reshape(n, 1, hw)

    out_tile_bytes = tc * spatial_tile_elems * elem_bytes
    lbl_tile_bytes = spatial_tile_elems * 4
    # Double-buffered tiles plus slack; capped at 48 MiB so it also fits v7x's
    # 64 MiB physical VMEM (v5e/v6e have 128 MiB, so this is safe everywhere).
    vmem_limit = int(min(48 << 20,
                         max(32 << 20, 3 * (out_tile_bytes + lbl_tile_bytes))))

    out = pl.pallas_call(
        _one_hot_kernel,
        out_shape=out_shape,
        grid_spec=pltpu.PrefetchScalarGridSpec(
            num_scalar_prefetch=0,
            grid=grid,
            in_specs=in_specs,
            out_specs=out_specs,
        ),
        compiler_params=pltpu.CompilerParams(
            # Every grid point writes a disjoint output tile -> fully parallel
            # (shards across both TensorCores on v7x; no-op on v5e/v6e).
            dimension_semantics=("parallel", "parallel", "parallel"),
            vmem_limit_bytes=vmem_limit),
    )(kernel_in)

    # Pure row-major reshape back to NCHW -- no transpose, no slice.
    return out.reshape((n, n_classes) + spatial)


if __name__ == "__main__":
    key = jax.random.PRNGKey(0)

    def ref_one_hot(t, n_classes, dtype=jnp.float32):
        nd = t.ndim
        oh = jax.nn.one_hot(t, n_classes, dtype=dtype)        # (N, *spatial, C)
        perm = (0, nd) + tuple(range(1, nd))
        return jnp.transpose(oh, perm)                        # (N, C, *spatial)

    k1, k2, k3, k4 = jax.random.split(key, 4)

    # 1) module-spec shapes: t=(2,16,16), n_classes=4 -> out (2,4,16,16)
    t1 = jax.random.randint(k1, (2, 16, 16), 0, 4, dtype=jnp.int32)
    out1 = one_hot_encoder(t1, 4)
    jax.block_until_ready(out1)
    assert out1.shape == (2, 4, 16, 16) and out1.dtype == jnp.float32
    assert bool(jnp.all(out1 == ref_one_hot(t1, 4)))

    # 2) lane-aligned spatial -> exercises the (N, C, HW//128, 128) layout path
    t2 = jax.random.randint(k2, (1, 32, 128), 0, 4, dtype=jnp.int32)
    out2 = one_hot_encoder(t2, 4)
    assert out2.shape == (1, 4, 32, 128)
    assert bool(jnp.all(out2 == ref_one_hot(t2, 4)))

    # 3) non-divisible spatial tiles (masked edge blocks, no padding/slicing)
    t3 = jax.random.randint(k3, (2, 20, 20), 0, 21, dtype=jnp.int32)
    out3 = one_hot_encoder(t3, 21, target_tile_bytes=21 * 128 * 4)
    assert out3.shape == (2, 21, 20, 20)
    assert bool(jnp.all(out3 == ref_one_hot(t3, 21)))

    # 4) class tiling (n_classes > 512) with a masked final class tile
    t4 = jax.random.randint(k4, (1, 4, 4), 0, 600, dtype=jnp.int32)
    out4 = one_hot_encoder(t4, 600)
    assert out4.shape == (1, 600, 4, 4)
    assert bool(jnp.all(out4 == ref_one_hot(t4, 600)))

    # 5) bf16 output (halves write traffic; exact for 0/1 values)
    out5 = one_hot_encoder(t2, 4, out_dtype=jnp.bfloat16)
    assert out5.dtype == jnp.bfloat16
    assert bool(jnp.all(out5 == ref_one_hot(t2, 4, jnp.bfloat16)))

    jax.block_until_ready((out1, out2, out3, out4, out5))
    print("KERNEL_OK")
</pallas_src>

<mosaic_0001>
module attributes {stable_mosaic.version = 11 : i64} {
  func.func @_one_hot_kernel(%arg0: i32, %arg1: i32, %arg2: i32, %arg3: memref<1x1x128xi32, #tpu.memory_space<vmem>>, %arg4: memref<1x4x128xf32, #tpu.memory_space<vmem>>) attributes {dimension_semantics = [#tpu.dimension_semantics<parallel>, #tpu.dimension_semantics<parallel>, #tpu.dimension_semantics<parallel>], iteration_bounds = array<i64: 2, 1, 2>, scalar_prefetch = 0 : i64, scratch_operands = 0 : i64, tpu.core_type = #tpu.core_type<tc>, window_params = [{transform_indices = @transform_0, window_bounds = array<i64: 1, 1, 128>}, {transform_indices = @transform_1, window_bounds = array<i64: 1, 4, 128>}]} {
    %c4_i32 = arith.constant 4 : i32
    %0 = arith.muli %arg1, %c4_i32 : i32
    %1 = tpu.iota {dimensions = array<i32: 1>} : vector<1x4x128xi32>
    %2 = vector.broadcast %0 : i32 to vector<1x4x128xi32>
    %3 = arith.addi %2, %1 : vector<1x4x128xi32>
    %c0 = arith.constant 0 : index
    %c0_0 = arith.constant 0 : index
    %c0_1 = arith.constant 0 : index
    %4 = vector.load %arg3[%c0, %c0_0, %c0_1] : memref<1x1x128xi32, #tpu.memory_space<vmem>>, vector<1x1x128xi32>
    %5 = vector.broadcast %4 : vector<1x1x128xi32> to vector<1x4x128xi32>
    %6 = arith.cmpi eq, %5, %3 : vector<1x4x128xi32>
    %7 = arith.extui %6 : vector<1x4x128xi1> to vector<1x4x128xi32>
    %8 = arith.sitofp %7 : vector<1x4x128xi32> to vector<1x4x128xf32>
    %c0_2 = arith.constant 0 : index
    %c0_3 = arith.constant 0 : index
    %c0_4 = arith.constant 0 : index
    %9 = vector.load %arg4[%c0_2, %c0_3, %c0_4] : memref<1x4x128xf32, #tpu.memory_space<vmem>>, vector<1x4x128xf32>
    tpu.vector_store %arg4[%c0_2, %c0_3, %c0_4], %8 {strides = array<i32>} : memref<1x4x128xf32, #tpu.memory_space<vmem>>, vector<1x4x128xf32>,
    return
  }
  func.func @transform_0(%arg0: i32, %arg1: i32, %arg2: i32) -> (i32, i32, i32) {
    %c0_i32 = arith.constant 0 : i32
    %c0_i32_0 = arith.constant 0 : i32
    return %arg0, %c0_i32, %arg2 : i32, i32, i32
  }
  func.func @transform_1(%arg0: i32, %arg1: i32, %arg2: i32) -> (i32, i32, i32) {
    %c0_i32 = arith.constant 0 : i32
    return %arg0, %arg1, %arg2 : i32, i32, i32
  }
}

</mosaic_0001>

<bundles_post_ra>
// kernel: tpu_custom_call.1
= control target key start
LH: loop header
LB: loop body
LE: loop exit
PB: predicated region body
PF: predicated region fallthrough
CT: control target
= control target key end

     0   :  { %6 = vsyncpa [#allocation3], 0  ;;  %s707_s0 = inlined_call_operand.hbm [shape: s32[2,1,256], index: 0, kind: input, shape index: {}]   ;;  %s708_s1 = inlined_call_operand.hbm [shape: f32[2,4,256], index: 1, kind: output, shape index: {}]  }
   0x1   :  { %8 = vsyncpa [#allocation3 + $0x1], 0 }
   0x2   :  { %9 = vsyncpa [#allocation4], 0 }
   0x3   :  { %11 = vsyncpa [#allocation4 + $0x1], 0  ;;  %s512_s6 = smov 0   ;;  %s514_s7 = smov 0  }
   0x4   :  { %s516_s8 = smov 0   ;;  %s518_s9 = smov 0  }
   0x5   :  { %s520_s10 = smov 0   ;;  %s522_s11 = smov 0  }
   0x6   :  { %s524_s12 = smov 0   ;;  %s526_s13 = smov 0  }
   0x7 LB: > { %s275_s14 = sadd.s32 4294967295, %s497_s13   ;;  %s276_s15 = sadd.s32 4294967294, %s497_s13   ;;  %s497_s13 = sphi %s526_s13, %s17_s13   ;;  %s493_s12 = sphi %s524_s12, %s725_s12   ;;  %s489_s11 = sphi %s522_s11, %s724_s11   ;;  %s485_s10 = sphi %s520_s10, %s723_s10   ;;  %s481_s9 = sphi %s518_s9, %s722_s9   ;;  %s477_s8 = sphi %s516_s8, %s721_s8   ;;  %s473_s7 = sphi %s514_s7, %s720_s7   ;;  %s469_s6 = sphi %s512_s6, %s719_s6  }
   0x8   : > { %s29_s16 = sadd.s32 1, %s489_s11  ;;  %s36_s17 = sadd.s32 1, %s493_s12 }
   0x9   : > { %p30_p0 = scmp.ge.s32.totalorder %s29_s16, 2  ;;  %s45_s18 = sadd.s32 1, %s477_s8 }
   0xa   : > { %p52_p1 = scmp.ne.s32.totalorder %s477_s8, %s473_s7  ;;  %p53_p2 = scmp.eq.s32.totalorder %s497_s13, 0 }
   0xb   : > { %s727_s16 = smov (%p30_p0, %s29_s16), 0  ;;  %s729_s17 = smov (!%p30_p0, %s36_s17), %s493_s12 }
   0xc   : > { %s41_s19 = ssub.s32 %s489_s11, %s727_s16  ;;  %p565_p3 = por %p53_p2, %p52_p1 }
   0xd   : > { %p38_p4 = scmp.ge.s32.totalorder %s729_s17, 2  ;;  %p58_p5 = scmp.ne.s32.totalorder %s473_s7, %s469_s6 }
   0xe   : > { %p59_p6 = scmp.eq.s32.totalorder %s275_s14, 0  ;;  %p86_p7 = scmp.eq.s32.totalorder %s275_s14, 3 }
   0xf   : > { %s731_s17 = smov (%p38_p4, %s729_s17), 0  ;;  %p92_p10 = scmp.eq.s32.totalorder %s276_s15, 3 }
  0x10   : > { %p573_p8 = por %p59_p6, %p58_p5  ;;  %p577_p9 = por %p86_p7, %p52_p1 }
  0x11   : > { %s40_s23 = ssub.s32 %s493_s12, %s731_s17  ;;  %p583_p12 = por %p92_p10, %p58_p5 }
  0x12   : > { %s712_s22 = scalar_select %p577_p9, 1, 0 }
  0x13   : > { %s42_s24 = sor.u32 %s41_s19, %s40_s23  ;;  %p302_p13 = scmp.lt.s32.totalorder %s497_s13, 4 }
  0x14   : > { %p43_p11 = scmp.eq.s32.totalorder %s42_s24, 0  ;;  %s112_s26 = sand.u32 1, %s477_s8  }
  0x15   : > { %s713_s25 = scalar_select %p583_p12, 1, 0 }
  0x16   : > { %s590_s27 = scalar_select %p43_p11, %s477_s8, %s45_s18  }
  0x17   : > { %s279_s28 = sshll.u32 %s493_s12, 1  ;;  %s115_s29 = scalar_lea.vmem [#allocation2], %s112_s26 }
  0x18   : > { %s124_s30 = sshll.u32 %s115_s29, 4  ;;  %s120_s2 = sadd.s32 %s489_s11, %s279_s28  ;;  %s594_s30 = int_to_ptr.vmem [resolvable:$true] %s124_s30 }
  0x19   : > { %s280_s3 = sshll.u32 %s120_s2, 4  ;;  %p598_p0 = pnand %p302_p13, %p565_p3 }
  0x1a   : > { %s605_s15 = scalar_lea.hbm %s707_s0, %s280_s3  ;;  %s113_s18 = scalar_lea.sflag [#allocation3], %s112_s26 }
  0x1b   : > { %s369_s19 = scalar_lea.hbm %s605_s15, 16  ;;  %p371_p3 = pneg %p598_p0 }
  0x1c   : > { %p370_p4 = scmp.ne.s32.totalorder %s605_s15, %s369_s19  ;;  %s374_s24 = scalar_lea.hbm %s707_s0, 64 }
  0x1d   : > { %p375_p7 = scmp.lt.u32.totalorder %s605_s15, %s707_s0  ;;  %p376_p10 = scmp.lt.u32.totalorder %s374_s24, %s369_s19 }
  0x1e   : > { %p372_p5 = pnand %p371_p3, %p370_p4  ;;  %p378_p13 = scmp.lt.u32.totalorder %s369_s19, %s605_s15 }
  0x1f   : > { %p377_p11 = por %p376_p10, %p375_p7 }
  0x20   : > { %p373_p6 = pneg %p372_p5 }
  0x21   : > { %p379_p1 = por %p378_p13, %p377_p11 }
  0x23   : > { %p380_p2 = pnand %p379_p1, %p373_p6 }
  0x25   : > { %383 = shalt.err (!%p380_p2)
}
  0x26   : > { %s384_s26 = scalar_lea.vmem %s594_s30, 16  ;;  %s499_s2 = smov [#allocation2]  }
  0x27   : > { %p385_p4 = scmp.ne.s32.totalorder %s594_s30, %s384_s26  ;;  %s389_s3 = sshll.u32 %s499_s2, 4  ;;  %s390_s3 = int_to_ptr.vmem [resolvable:$false] %s389_s3 }
  0x28   : > { %s391_s5 = scalar_lea.vmem %s390_s3, 32  ;;  %p392_p9 = scmp.lt.s32.totalorder %s594_s30, %s390_s3 }
  0x29   : > { %p387_p5 = pnand %p385_p4, %p371_p3  ;;  %p393_p7 = scmp.lt.s32.totalorder %s391_s5, %s384_s26 }
  0x2b   : > { %p388_p12 = pneg %p387_p5  ;;  %p394_p10 = por %p393_p7, %p392_p9 }
  0x2d   : > { %p395_p11 = pnand %p394_p10, %p388_p12 }
  0x2f   : > { %398 = shalt.err (!%p395_p11)
}
  0x30   : > { %297 = dma.hbm_to_vmem [thread:$0]  (!%p598_p0), %s605_s15, 16, %s594_s30, %s113_s18  }
  0x31   : > { %p715_p1 = scmp.lt.s32.totalorder %s497_s13, 5  ;;  %p716_p2 = scmp.ge.s32.totalorder %s497_s13, 1 }
  0x33   : > { %p130_p3 = pnand %p716_p2, %p715_p1 }
  0x34   : > { %s639_s14 = sand.u32 (!%p130_p3), 1, %s473_s7  }
  0x35   : > { %133 = sbr.rel (%p130_p3) target bundleno = 88 (0x58), region = 24  ;;  %s136_s19 = scalar_lea.sflag (!%p130_p3), [#allocation3], %s639_s14 }
  0x36   : > { %s138_s20 = scalar_lea.vmem (!%p130_p3), [#allocation2], %s639_s14 }
  0x3c   : > { %460 = dma.done.wait (%p573_p8), %s136_s19, 16  }
  0x3d   : > { %462 = vsyncadd (%p573_p8), %s136_s19, 4294967280  ;;  %s282_s30 = sshll.u32 %s639_s14, 2  ;;  %v157_v0 = vlaneseq  ;;  %s286_s4 = sshll.u32 %s485_s10, 1  ;;  %v283_v2 = vld [vmem:[%s138_s20] ss:$0 sm:$0xff]  ;;  %v500_v3 = vmov 0.0  }
  0x3e   : > { %s184_s15 = sadd.s32 %s481_s9, %s286_s4  ;;  %s155_s18 = scalar_lea.vmem [#allocation5], %s282_s30 }
  0x3f   : > { %v158_v1 = vshrl.u32 %v157_v0, 7  ;;  %s188_s23 = sshll.u32 %s155_s18, 4  ;;  %s287_s24 = sshll.u32 %s184_s15, 6  ;;  %s650_s23 = int_to_ptr.vmem [resolvable:$true] %s188_s23 }
  0x40   : > { %s655_s29 = scalar_lea.hbm %s708_s1, %s287_s24  ;;  %s171_s9 = scalar_lea.sflag [#allocation4], %s639_s14 }
  0x41   : > { %vm166_vm0 = vcmp.eq.s32.totalorder %v283_v2, %v158_v1  ;;  %s399_s10 = scalar_lea.vmem %s650_s23, 64  ;;  %p717_p9 = scmp.ne.s32.totalorder %s712_s22, 0 }
  0x42   : > { %v284_v4 = vsel %vm166_vm0, 1.0, %v500_v3  ;;  %p400_p8 = scmp.ne.s32.totalorder %s650_s23, %s399_s10  ;;  %s501_s26 = smov [#allocation5]  }
  0x43   : > { %169 = vst [vmem:[%s155_s18] sm:$0xf] %v284_v4  ;;  %s403_s2 = sshll.u32 %s501_s26, 4  ;;  %s404_s2 = int_to_ptr.vmem [resolvable:$false] %s403_s2 }
  0x44   : > { %p401_p12 = pnand %p400_p8, %p717_p9  ;;  %s405_s3 = scalar_lea.vmem %s404_s2, 128 }
  0x45   : > { %p406_p6 = scmp.lt.s32.totalorder %s650_s23, %s404_s2  ;;  %p407_p13 = scmp.lt.s32.totalorder %s405_s3, %s399_s10 }
  0x46   : > { %p402_p0 = pneg %p401_p12 }
  0x47   : > { %p408_p4 = por %p407_p13, %p406_p6 }
  0x49   : > { %p409_p5 = pnand %p408_p4, %p402_p0 }
  0x4b   : > { %412 = shalt.err (!%p409_p5)
}
  0x4c   : > { %s413_s5 = scalar_lea.hbm %s655_s29, 64  ;;  %s417_s20 = scalar_lea.hbm %s708_s1, 256 }
  0x4d   : > { %p414_p7 = scmp.ne.s32.totalorder %s655_s29, %s413_s5  ;;  %p418_p1 = scmp.lt.u32.totalorder %s655_s29, %s708_s1 }
  0x4e   : > { %p419_p2 = scmp.lt.u32.totalorder %s417_s20, %s413_s5  ;;  %p421_p8 = scmp.lt.u32.totalorder %s413_s5, %s655_s29 }
  0x4f   : > { %p415_p10 = pnand %p414_p7, %p717_p9 }
  0x50   : > { %p420_p3 = por %p419_p2, %p418_p1 }
  0x51   : > { %p416_p11 = pneg %p415_p10 }
  0x52   : > { %p422_p12 = por %p421_p8, %p420_p3 }
  0x54   : > { %p423_p0 = pnand %p422_p12, %p416_p11 }
  0x56   : > { %426 = shalt.err (!%p423_p0)
}
  0x57   : > { %292 = dma.vmem_to_hbm [thread:$0]  (%p717_p9), %s650_s23, 64, %s655_s29, %s171_s9  }
  0x58 PF: > { %p303_p6 = scmp.ge.s32.totalorder %s497_s13, 2  ;;  %s200_s15 = sand.u32 1, %s469_s6  }
  0x59   : > { %p718_p13 = scmp.ne.s32.totalorder %s713_s25, 0  ;;  %s201_s18 = scalar_lea.sflag [#allocation4], %s200_s15 }
  0x5b   : > { %p299_p4 = pnand %p303_p6, %p718_p13 }
  0x5d   : > { %464 = dma.done.wait (!%p299_p4), %s201_s18, 64  }
  0x5e   : > { %466 = vsyncadd (!%p299_p4), %s201_s18, 4294967232  ;;  %s17_s13 = sadd.s32 1, %s497_s13   ;;  %s719_s6 = smov %s473_s7 }
  0x5f   : > { %p14_p5 = scmp.ge.s32.totalorder %s17_s13, 6   ;;  %s720_s7 = smov %s477_s8 }
  0x60   : > { %s721_s8 = smov %s590_s27  ;;  %s722_s9 = smov %s489_s11 }
  0x61   : > { %s723_s10 = smov %s493_s12  ;;  %s724_s11 = smov %s727_s16 }
  0x62   : > { %s725_s12 = smov %s731_s17  ;;  %16 = sbr.rel (!%p14_p5) target bundleno = 7 (0x7), region = 69 }
  0x69   :  { %206 = vsyncpa [#allocation3], 1 }
  0x6a   :  { %208 = vsyncpa [#allocation3 + $0x1], 1 }
  0x6b   :  { %209 = vsyncpa [#allocation4], 1 }
  0x6c   :  { %211 = vsyncpa [#allocation4 + $0x1], 1 }

</bundles_post_ra>
